<compile_context>
chip_gen: v7x
topology: tpu7x:2x2x1
jax: 0.10.0
libtpu: 0.0.40
codegen_flags: <defaults>
</compile_context>

<pallas_src>
import math

import jax
import jax.numpy as jnp
from jax import lax
from jax.experimental import pallas as pl
from jax.experimental.pallas import tpu as pltpu

EPS = 1e-5  # torch.nn.LayerNorm default


def _round_up(x, m):
    return ((x + m - 1) // m) * m


def _cdiv(a, b):
    return (a + b - 1) // b


# ---------------------------------------------------------------------------
# Kernels
# ---------------------------------------------------------------------------
def _residual_layernorm(x_f32, mlp_f32, b2, gamma, beta, out_dtype):
    # TODO(synk): Dropout(p=0.1) is identity (eval mode); training-mode dropout
    # with RNG is not implemented.
    y = x_f32 + mlp_f32 + b2
    mu = jnp.mean(y, axis=-1, keepdims=True)
    var = jnp.mean(jnp.square(y - mu), axis=-1, keepdims=True)
    normed = (y - mu) * lax.rsqrt(var + EPS)
    return (normed * gamma + beta).astype(out_dtype)


def _ffn_single_kernel(x_ref, w1_ref, b1_ref, w2_ref, b2_ref, g_ref, bt_ref,
                       o_ref):
    """dim_ff fits in one block: no accumulator init / RMW round trip."""
    xc = x_ref[...].astype(w1_ref.dtype)
    h = jnp.dot(xc, w1_ref[...], preferred_element_type=jnp.float32)
    h = jnp.maximum(h + b1_ref[...], 0.0)
    mlp = jnp.dot(h.astype(w2_ref.dtype), w2_ref[...],
                  preferred_element_type=jnp.float32)
    o_ref[...] = _residual_layernorm(x_ref[...].astype(jnp.float32), mlp,
                                     b2_ref[...], g_ref[...], bt_ref[...],
                                     o_ref.dtype)


def _ffn_acc_kernel(x_ref, w1_ref, b1_ref, w2_ref, b2_ref, g_ref, bt_ref,
                    o_ref, acc_ref):
    """dim_ff tiled as reduction grid axis 1 with an f32 VMEM accumulator."""
    kf = pl.program_id(1)

    @pl.when(kf == 0)
    def _init():
        acc_ref[...] = jnp.zeros_like(acc_ref)

    xc = x_ref[...].astype(w1_ref.dtype)
    h = jnp.dot(xc, w1_ref[...], preferred_element_type=jnp.float32)
    h = jnp.maximum(h + b1_ref[...], 0.0)
    acc_ref[...] += jnp.dot(h.astype(w2_ref.dtype), w2_ref[...],
                            preferred_element_type=jnp.float32)

    @pl.when(kf == pl.num_programs(1) - 1)
    def _finalize():
        o_ref[...] = _residual_layernorm(x_ref[...].astype(jnp.float32),
                                         acc_ref[...], b2_ref[...], g_ref[...],
                                         bt_ref[...], o_ref.dtype)


# ---------------------------------------------------------------------------
# VMEM budgeting helpers
# ---------------------------------------------------------------------------
def _physical_vmem_bytes():
    try:
        info = pltpu.get_tpu_info()
        cap = getattr(info, "vmem_capacity_bytes", None)
        if cap:
            return int(cap)
    except Exception:
        pass
    return 64 << 20  # conservative: assume v7x-sized VMEM


def _vmem_footprint(tm, tf, D, xbytes, cbytes, obytes, multi_pass, w_bufs=2):
    b = 2 * xbytes * tm * D             # x tile (matmul input + residual)
    b += w_bufs * cbytes * D * tf       # w1 chunk
    b += w_bufs * cbytes * tf * D       # w2 chunk
    b += 2 * 4 * (tf + 3 * D)           # b1 / b2 / gamma / beta
    b += 2 * obytes * tm * D            # output tile
    b += (4 + cbytes) * tm * tf         # h intermediate (f32) + its cast copy
    if multi_pass:
        b += 4 * tm * D                 # f32 accumulator scratch
    return b + (2 << 20)                # headroom


def _weight_spec(shape, index_map, nbuf):
    if nbuf > 2 and hasattr(pl, "Buffered"):
        try:
            return pl.BlockSpec(shape, index_map, pipeline_mode=pl.Buffered(nbuf))
        except TypeError:
            pass
    return pl.BlockSpec(shape, index_map)


# ---------------------------------------------------------------------------
# Wrapper
# ---------------------------------------------------------------------------
def feed_forward_network(x, params, *, compute_dtype=jnp.bfloat16,
                         block_m=512, block_f=None):
    """out = LayerNorm(x + MLP(x)) for x of shape (..., D)."""
    orig_shape = x.shape
    D = orig_shape[-1]
    F = params["w1"].shape[1]

    # Fold all leading dims into a lane-dense (M, D) slab.
    x2 = x.reshape(-1, D)
    M = x2.shape[0]

    xbytes = x.dtype.itemsize
    obytes = x.dtype.itemsize
    cbytes = jnp.dtype(compute_dtype).itemsize

    # --- M tiling: large tiles for weight reuse, but >= 2 tiles for megacore ---
    tm = min(block_m, _round_up(M, 8))
    if _cdiv(M, tm) < 2 and tm >= 16:
        tm = _round_up(_cdiv(tm, 2), 8)

    # --- Pad dim_ff to a multiple of 256 (exact: padded weight cols/rows are 0,
    #     ReLU(0) = 0, so padded lanes contribute nothing). ---
    Fp = _round_up(F, 256)
    if block_f is None:
        tf = 512 if Fp % 512 == 0 else 256
    else:
        tf = block_f
        assert Fp % tf == 0, "padded dim_ff must be divisible by block_f"
    tf = min(tf, Fp)

    # --- Fit the double-buffered footprint into the per-chip VMEM budget. ---
    phys_vmem = _physical_vmem_bytes()
    budget = min(int(phys_vmem * 0.75), phys_vmem - (8 << 20))
    while (_vmem_footprint(tm, tf, D, xbytes, cbytes, obytes, Fp > tf) > budget
           and (tf > 128 or tm > 128)):
        if tf > 128:
            tf //= 2
        else:
            tm = max(128, _round_up(tm // 2, 8))

    Mp = _round_up(M, tm)
    if Mp != M:
        x2 = jnp.pad(x2, ((0, Mp - M), (0, 0)))

    num_m = Mp // tm
    num_f = Fp // tf
    multi_pass = num_f > 1

    # --- Cast / pad parameters wrapper-side. Weights go to compute_dtype; bias,
    #     gamma, beta and the residual path stay f32. ---
    w1 = params["w1"].astype(compute_dtype)
    w2 = params["w2"].astype(compute_dtype)
    b1 = params["b1"].astype(jnp.float32)
    b2 = params["b2"].astype(jnp.float32)
    gamma = params["gamma"].astype(jnp.float32)
    beta = params["beta"].astype(jnp.float32)
    if Fp != F:
        w1 = jnp.pad(w1, ((0, 0), (0, Fp - F)))
        b1 = jnp.pad(b1, ((0, 0), (0, Fp - F)))
        w2 = jnp.pad(w2, ((0, Fp - F), (0, 0)))

    # Triple-buffer the streamed weight chunks if there is VMEM headroom.
    w_bufs = 2
    if multi_pass and num_f >= 3:
        if _vmem_footprint(tm, tf, D, xbytes, cbytes, obytes, True, 3) <= budget:
            w_bufs = 3

    footprint = _vmem_footprint(tm, tf, D, xbytes, cbytes, obytes, multi_pass,
                                w_bufs)
    vmem_limit = int(min(max(footprint, 4 << 20), budget))

    cost = pl.CostEstimate(
        flops=int(4 * Mp * D * Fp + 8 * Mp * D),
        transcendentals=int(Mp),  # one rsqrt per row
        bytes_accessed=int(xbytes * Mp * D
                           + num_m * cbytes * (D * Fp + Fp * D)  # per-M-tile weight re-stream
                           + num_m * 4 * (Fp + 3 * D)
                           + obytes * Mp * D),
    )

    if multi_pass:
        grid = (num_m, num_f)
        in_specs = [
            pl.BlockSpec((tm, D), lambda i, k: (i, 0)),           # x (input + residual)
            _weight_spec((D, tf), lambda i, k: (0, k), w_bufs),   # w1 chunk
            pl.BlockSpec((1, tf), lambda i, k: (0, k)),           # b1 chunk
            _weight_spec((tf, D), lambda i, k: (k, 0), w_bufs),   # w2 chunk
            pl.BlockSpec((1, D), lambda i, k: (0, 0)),            # b2
            pl.BlockSpec((1, D), lambda i, k: (0, 0)),            # gamma
            pl.BlockSpec((1, D), lambda i, k: (0, 0)),            # beta
        ]
        out_specs = pl.BlockSpec((tm, D), lambda i, k: (i, 0))
        kernel = _ffn_acc_kernel
        scratch = [pltpu.VMEM((tm, D), jnp.float32)]
        semantics = ("parallel", "arbitrary")
    else:
        grid = (num_m,)
        in_specs = [
            pl.BlockSpec((tm, D), lambda i: (i, 0)),
            pl.BlockSpec((D, Fp), lambda i: (0, 0)),
            pl.BlockSpec((1, Fp), lambda i: (0, 0)),
            pl.BlockSpec((Fp, D), lambda i: (0, 0)),
            pl.BlockSpec((1, D), lambda i: (0, 0)),
            pl.BlockSpec((1, D), lambda i: (0, 0)),
            pl.BlockSpec((1, D), lambda i: (0, 0)),
        ]
        out_specs = pl.BlockSpec((tm, D), lambda i: (i, 0))
        kernel = _ffn_single_kernel
        scratch = []
        semantics = ("parallel",)

    out = pl.pallas_call(
        kernel,
        out_shape=jax.ShapeDtypeStruct((Mp, D), x.dtype),
        grid=grid,
        in_specs=in_specs,
        out_specs=out_specs,
        scratch_shapes=scratch,
        compiler_params=pltpu.CompilerParams(
            dimension_semantics=semantics,
            vmem_limit_bytes=vmem_limit,
        ),
        cost_estimate=cost,
    )(x2, w1, b1, w2, b2, gamma, beta)

    return out[:M].reshape(orig_shape)


# ---------------------------------------------------------------------------
# Parameter init (PyTorch Linear / LayerNorm defaults) + JAX reference.
# ---------------------------------------------------------------------------
def init_ffn_params(key, dim_model, dim_ff):
    k1, k2, k3, k4 = jax.random.split(key, 4)
    bound1 = 1.0 / math.sqrt(dim_model)
    bound2 = 1.0 / math.sqrt(dim_ff)
    return dict(
        w1=jax.random.uniform(k1, (dim_model, dim_ff), jnp.float32, -bound1, bound1),
        b1=jax.random.uniform(k2, (1, dim_ff), jnp.float32, -bound1, bound1),
        w2=jax.random.uniform(k3, (dim_ff, dim_model), jnp.float32, -bound2, bound2),
        b2=jax.random.uniform(k4, (1, dim_model), jnp.float32, -bound2, bound2),
        gamma=jnp.ones((1, dim_model), jnp.float32),
        beta=jnp.zeros((1, dim_model), jnp.float32),
    )


def reference(x, p):
    h = jnp.maximum(x @ p["w1"] + p["b1"], 0.0)
    y = x + h @ p["w2"] + p["b2"]
    mu = y.mean(-1, keepdims=True)
    var = ((y - mu) ** 2).mean(-1, keepdims=True)
    return (y - mu) / jnp.sqrt(var + EPS) * p["gamma"] + p["beta"]


# ---------------------------------------------------------------------------
if __name__ == "__main__":
    key = jax.random.PRNGKey(0)

    # Case 1: small shapes, single-pass kernel (dim_ff fits one block).
    B, S, D, F = 2, 8, 128, 256
    kx, kp, key = jax.random.split(key, 3)
    x = jax.random.normal(kx, (B, S, D), jnp.float32)
    params = init_ffn_params(kp, D, F)
    ref = reference(x, params)

    out_f32 = jax.block_until_ready(
        feed_forward_network(x, params, compute_dtype=jnp.float32))
    assert out_f32.shape == x.shape
    assert bool(jnp.all(jnp.isfinite(out_f32)))
    assert bool(jnp.allclose(out_f32, ref, atol=2e-3, rtol=2e-3)), (
        f"f32 max abs err = {float(jnp.max(jnp.abs(out_f32 - ref)))}")

    out_bf16 = jax.block_until_ready(feed_forward_network(x, params))
    assert bool(jnp.all(jnp.isfinite(out_bf16)))
    assert bool(jnp.allclose(out_bf16, ref, atol=3e-2, rtol=3e-2)), (
        f"bf16 max abs err = {float(jnp.max(jnp.abs(out_bf16 - ref)))}")

    # Case 2: larger dim_ff forces the multi-pass (accumulator) kernel path.
    B2, S2, D2, F2 = 4, 16, 128, 1024
    kx2, kp2, key = jax.random.split(key, 3)
    x2 = jax.random.normal(kx2, (B2, S2, D2), jnp.float32)
    params2 = init_ffn_params(kp2, D2, F2)
    ref2 = reference(x2, params2)

    out2 = jax.block_until_ready(
        feed_forward_network(x2, params2, block_f=256))
    assert out2.shape == x2.shape
    assert bool(jnp.all(jnp.isfinite(out2)))
    assert bool(jnp.allclose(out2, ref2, atol=3e-2, rtol=3e-2)), (
        f"multi-pass max abs err = {float(jnp.max(jnp.abs(out2 - ref2)))}")

    print("KERNEL_OK")
</pallas_src>

<mosaic_0001>
module attributes {stable_mosaic.version = 11 : i64} {
  func.func @_ffn_single_kernel(%arg0: i32, %arg1: memref<8x128xf32, #tpu.memory_space<vmem>>, %arg2: memref<128x256xf32, #tpu.memory_space<vmem>>, %arg3: memref<1x256xf32, #tpu.memory_space<vmem>>, %arg4: memref<256x128xf32, #tpu.memory_space<vmem>>, %arg5: memref<1x128xf32, #tpu.memory_space<vmem>>, %arg6: memref<1x128xf32, #tpu.memory_space<vmem>>, %arg7: memref<1x128xf32, #tpu.memory_space<vmem>>, %arg8: memref<8x128xf32, #tpu.memory_space<vmem>>) attributes {dimension_semantics = [#tpu.dimension_semantics<parallel>], iteration_bounds = array<i64: 2>, scalar_prefetch = 0 : i64, scratch_operands = 0 : i64, tpu.core_type = #tpu.core_type<tc>, window_params = [{transform_indices = @transform_0, window_bounds = array<i64: 8, 128>}, {pipeline_mode = #tpu.pipeline_mode<synchronous>, transform_indices = @transform_1, window_bounds = array<i64: 128, 256>}, {pipeline_mode = #tpu.pipeline_mode<synchronous>, transform_indices = @transform_2, window_bounds = array<i64: 1, 256>}, {pipeline_mode = #tpu.pipeline_mode<synchronous>, transform_indices = @transform_3, window_bounds = array<i64: 256, 128>}, {pipeline_mode = #tpu.pipeline_mode<synchronous>, transform_indices = @transform_4, window_bounds = array<i64: 1, 128>}, {pipeline_mode = #tpu.pipeline_mode<synchronous>, transform_indices = @transform_5, window_bounds = array<i64: 1, 128>}, {pipeline_mode = #tpu.pipeline_mode<synchronous>, transform_indices = @transform_6, window_bounds = array<i64: 1, 128>}, {transform_indices = @transform_7, window_bounds = array<i64: 8, 128>}]} {
    %c0 = arith.constant 0 : index
    %c0_0 = arith.constant 0 : index
    %0 = vector.load %arg1[%c0, %c0_0] : memref<8x128xf32, #tpu.memory_space<vmem>>, vector<8x128xf32>
    %c0_1 = arith.constant 0 : index
    %c0_2 = arith.constant 0 : index
    %1 = vector.load %arg2[%c0_1, %c0_2] : memref<128x256xf32, #tpu.memory_space<vmem>>, vector<128x256xf32>
    %cst = arith.constant dense<0.000000e+00> : vector<8x256xf32>
    %2 = tpu.matmul %0, %1, %cst {dimension_numbers = #tpu.dot_dimension_numbers<[1], [0], [0], [1], [0, 0, 1, 1], [], []>} : vector<8x128xf32>, vector<128x256xf32>, vector<8x256xf32> -> vector<8x256xf32>
    %c0_3 = arith.constant 0 : index
    %c0_4 = arith.constant 0 : index
    %3 = vector.load %arg3[%c0_3, %c0_4] : memref<1x256xf32, #tpu.memory_space<vmem>>, vector<1x256xf32>
    %4 = vector.broadcast %3 : vector<1x256xf32> to vector<8x256xf32>
    %5 = arith.addf %2, %4 : vector<8x256xf32>
    %cst_5 = arith.constant 0.000000e+00 : f32
    %6 = vector.broadcast %cst_5 : f32 to vector<8x256xf32>
    %7 = arith.maximumf %5, %6 : vector<8x256xf32>
    %c0_6 = arith.constant 0 : index
    %c0_7 = arith.constant 0 : index
    %8 = vector.load %arg4[%c0_6, %c0_7] : memref<256x128xf32, #tpu.memory_space<vmem>>, vector<256x128xf32>
    %cst_8 = arith.constant dense<0.000000e+00> : vector<8x128xf32>
    %9 = tpu.matmul %7, %8, %cst_8 {dimension_numbers = #tpu.dot_dimension_numbers<[1], [0], [0], [1], [0, 0, 1, 1], [], []>} : vector<8x256xf32>, vector<256x128xf32>, vector<8x128xf32> -> vector<8x128xf32>
    %c0_9 = arith.constant 0 : index
    %c0_10 = arith.constant 0 : index
    %10 = vector.load %arg1[%c0_9, %c0_10] : memref<8x128xf32, #tpu.memory_space<vmem>>, vector<8x128xf32>
    %c0_11 = arith.constant 0 : index
    %c0_12 = arith.constant 0 : index
    %11 = vector.load %arg5[%c0_11, %c0_12] : memref<1x128xf32, #tpu.memory_space<vmem>>, vector<1x128xf32>
    %c0_13 = arith.constant 0 : index
    %c0_14 = arith.constant 0 : index
    %12 = vector.load %arg6[%c0_13, %c0_14] : memref<1x128xf32, #tpu.memory_space<vmem>>, vector<1x128xf32>
    %c0_15 = arith.constant 0 : index
    %c0_16 = arith.constant 0 : index
    %13 = vector.load %arg7[%c0_15, %c0_16] : memref<1x128xf32, #tpu.memory_space<vmem>>, vector<1x128xf32>
    %14 = arith.addf %10, %9 : vector<8x128xf32>
    %15 = vector.broadcast %11 : vector<1x128xf32> to vector<8x128xf32>
    %16 = arith.addf %14, %15 : vector<8x128xf32>
    %cst_17 = arith.constant dense<0.000000e+00> : vector<8xf32>
    %17 = vector.multi_reduction <add>, %16, %cst_17 [1] : vector<8x128xf32> to vector<8xf32>
    %18 = vector.shape_cast %17 : vector<8xf32> to vector<8x1xf32>
    %cst_18 = arith.constant 1.280000e+02 : f32
    %19 = vector.broadcast %cst_18 : f32 to vector<8x1xf32>
    %20 = arith.divf %18, %19 : vector<8x1xf32>
    %21 = vector.broadcast %20 : vector<8x1xf32> to vector<8x128xf32>
    %22 = arith.subf %16, %21 : vector<8x128xf32>
    %23 = arith.mulf %22, %22 : vector<8x128xf32>
    %cst_19 = arith.constant dense<0.000000e+00> : vector<8xf32>
    %24 = vector.multi_reduction <add>, %23, %cst_19 [1] : vector<8x128xf32> to vector<8xf32>
    %25 = vector.shape_cast %24 : vector<8xf32> to vector<8x1xf32>
    %cst_20 = arith.constant 1.280000e+02 : f32
    %26 = vector.broadcast %cst_20 : f32 to vector<8x1xf32>
    %27 = arith.divf %25, %26 : vector<8x1xf32>
    %28 = vector.broadcast %20 : vector<8x1xf32> to vector<8x128xf32>
    %29 = arith.subf %16, %28 : vector<8x128xf32>
    %cst_21 = arith.constant 9.99999974E-6 : f32
    %30 = vector.broadcast %cst_21 : f32 to vector<8x1xf32>
    %31 = arith.addf %27, %30 : vector<8x1xf32>
    %32 = math.rsqrt %31 : vector<8x1xf32>
    %33 = vector.broadcast %32 : vector<8x1xf32> to vector<8x128xf32>
    %34 = arith.mulf %29, %33 : vector<8x128xf32>
    %35 = vector.broadcast %12 : vector<1x128xf32> to vector<8x128xf32>
    %36 = arith.mulf %34, %35 : vector<8x128xf32>
    %37 = vector.broadcast %13 : vector<1x128xf32> to vector<8x128xf32>
    %38 = arith.addf %36, %37 : vector<8x128xf32>
    %c0_22 = arith.constant 0 : index
    %c0_23 = arith.constant 0 : index
    %39 = vector.load %arg8[%c0_22, %c0_23] : memref<8x128xf32, #tpu.memory_space<vmem>>, vector<8x128xf32>
    tpu.vector_store %arg8[%c0_22, %c0_23], %38 {strides = array<i32>} : memref<8x128xf32, #tpu.memory_space<vmem>>, vector<8x128xf32>,
    return
  }
  func.func @transform_0(%arg0: i32) -> (i32, i32) {
    %c0_i32 = arith.constant 0 : i32
    %c0_i32_0 = arith.constant 0 : i32
    return %arg0, %c0_i32 : i32, i32
  }
  func.func @transform_1(%arg0: i32) -> (i32, i32) {
    %c0_i32 = arith.constant 0 : i32
    %c0_i32_0 = arith.constant 0 : i32
    %c0_i32_1 = arith.constant 0 : i32
    return %c0_i32, %c0_i32_0 : i32, i32
  }
  func.func @transform_2(%arg0: i32) -> (i32, i32) {
    %c0_i32 = arith.constant 0 : i32
    %c0_i32_0 = arith.constant 0 : i32
    %c0_i32_1 = arith.constant 0 : i32
    return %c0_i32, %c0_i32_0 : i32, i32
  }
  func.func @transform_3(%arg0: i32) -> (i32, i32) {
    %c0_i32 = arith.constant 0 : i32
    %c0_i32_0 = arith.constant 0 : i32
    %c0_i32_1 = arith.constant 0 : i32
    return %c0_i32, %c0_i32_0 : i32, i32
  }
  func.func @transform_4(%arg0: i32) -> (i32, i32) {
    %c0_i32 = arith.constant 0 : i32
    %c0_i32_0 = arith.constant 0 : i32
    %c0_i32_1 = arith.constant 0 : i32
    return %c0_i32, %c0_i32_0 : i32, i32
  }
  func.func @transform_5(%arg0: i32) -> (i32, i32) {
    %c0_i32 = arith.constant 0 : i32
    %c0_i32_0 = arith.constant 0 : i32
    %c0_i32_1 = arith.constant 0 : i32
    return %c0_i32, %c0_i32_0 : i32, i32
  }
  func.func @transform_6(%arg0: i32) -> (i32, i32) {
    %c0_i32 = arith.constant 0 : i32
    %c0_i32_0 = arith.constant 0 : i32
    %c0_i32_1 = arith.constant 0 : i32
    return %c0_i32, %c0_i32_0 : i32, i32
  }
  func.func @transform_7(%arg0: i32) -> (i32, i32) {
    %c0_i32 = arith.constant 0 : i32
    %c0_i32_0 = arith.constant 0 : i32
    return %arg0, %c0_i32 : i32, i32
  }
}

</mosaic_0001>

<bundles_post_ra>
// kernel: tpu_custom_call.1
= control target key start
LH: loop header
LB: loop body
LE: loop exit
PB: predicated region body
PF: predicated region fallthrough
CT: control target
= control target key end

     0   :  { %12 = vsyncpa [#allocation3], 0  ;;  %s1331_s0 = inlined_call_operand.hbm [shape: f32[16,128], index: 0, kind: input, shape index: {}]   ;;  %s1332_s1 = inlined_call_operand.hbm [shape: f32[128,256], index: 1, kind: input, shape index: {}]   ;;  %s1333_s2 = inlined_call_operand.vmem [shape: f32[1,256], index: 2, kind: input, shape index: {}]   ;;  %s1334_s3 = inlined_call_operand.hbm [shape: f32[256,128], index: 3, kind: input, shape index: {}]   ;;  %s1335_s4 = inlined_call_operand.vmem [shape: f32[1,128], index: 4, kind: input, shape index: {}]   ;;  %s1336_s5 = inlined_call_operand.vmem [shape: f32[1,128], index: 5, kind: input, shape index: {}]   ;;  %s1337_s6 = inlined_call_operand.vmem [shape: f32[1,128], index: 6, kind: input, shape index: {}]   ;;  %s1338_s7 = inlined_call_operand.hbm [shape: f32[16,128], index: 7, kind: output, shape index: {}]  }
   0x1   :  { %14 = vsyncpa [#allocation3 + $0x1], 0 }
   0x2   :  { %15 = vsyncpa [#allocation6], 0 }
   0x3   :  { %16 = vsyncpa [#allocation4], 0 }
   0x4   :  { %18 = vsyncpa [#allocation4 + $0x1], 0  ;;  %s1083_s24 = smov 0   ;;  %s1085_s25 = smov 0  }
   0x5   :  { %s1087_s26 = smov 0   ;;  %s1089_s27 = smov 0  }
   0x6 LB: > { %s1104_s28 = sadd.s32 4294967295, %s1032_s27   ;;  %s684_s29 = sadd.s32 4294967294, %s1032_s27   ;;  %s1032_s27 = sphi %s1089_s27, %s1358_s27   ;;  %s1028_s26 = sphi %s1087_s26, %s1357_s26   ;;  %s1024_s25 = sphi %s1085_s25, %s1356_s25   ;;  %s1020_s24 = sphi %s1083_s24, %s1355_s24  }
   0x7   : > { %p44_p0 = scmp.ne.s32.totalorder %s1024_s25, %s1020_s24  ;;  %p1339_p1 = scmp.eq.s32.totalorder %s1104_s28, 0 }
   0x8   : > { %p200_p3 = scmp.eq.s32.totalorder %s684_s29, 1  ;;  %p685_p5 = scmp.ge.s32.totalorder %s1032_s27, 1 }
   0x9   : > { %p1113_p4 = por %p1339_p1, %p44_p0  ;;  %p207_p7 = scmp.lt.s32.totalorder %s1032_s27, 3 }
   0xa   : > { %p1118_p6 = por %p200_p3, %p44_p0  ;;  %s1034_s10 = smov [#allocation5]  }
   0xb   : > { %s1342_s30 = scalar_select %p1113_p4, 1, 0 }
   0xc   : > { %s1343_s8 = scalar_select %p1118_p6, 1, 0 }
   0xd   : > { %p1123_p8 = pnand %p685_p5, %p207_p7  ;;  %s219_s11 = sshll.u32 %s1034_s10, 4  ;;  %s1127_s11 = int_to_ptr.vmem [resolvable:$true] %s219_s11 }
   0xe   : > { %s1035_s13 = smov [#allocation7]   ;;  %s876_s17 = scalar_lea.hbm %s1332_s1, 4096 }
   0xf   : > { %p814_p9 = pneg %p1123_p8  ;;  %s235_s14 = sshll.u32 %s1035_s13, 4  ;;  %s1138_s14 = int_to_ptr.vmem [resolvable:$true] %s235_s14 }
  0x10   : > { %p877_p12 = scmp.ne.s32.totalorder %s1332_s1, %s876_s17  ;;  %p883_p5 = scmp.lt.u32.totalorder %s876_s17, %s1332_s1 }
  0x11   : > { %p1134_p11 = pnand %p814_p9, %p1339_p1 }
  0x13   : > { %p878_p13 = pneg %p1134_p11 }
  0x15   : > { %p879_p0 = pnand %p878_p13, %p877_p12 }
  0x17   : > { %p880_p3 = pneg %p879_p0 }
  0x19   : > { %p885_p7 = pnand %p883_p5, %p880_p3 }
  0x1b   : > { %888 = shalt.err (!%p885_p7)
}
  0x1c   : > { %s889_s22 = scalar_lea.vmem %s1127_s11, 4096  ;;  %p897_p2 = scmp.lt.s32.totalorder %s1127_s11, %s1127_s11 }
  0x1d   : > { %p890_p9 = scmp.ne.s32.totalorder %s1127_s11, %s889_s22  ;;  %p898_p12 = scmp.lt.s32.totalorder %s889_s22, %s889_s22 }
  0x1f   : > { %p892_p10 = pnand %p890_p9, %p878_p13  ;;  %p899_p0 = por %p898_p12, %p897_p2 }
  0x21   : > { %p893_p1 = pneg %p892_p10 }
  0x23   : > { %p900_p6 = pnand %p899_p0, %p893_p1 }
  0x25   : > { %903 = shalt.err (!%p900_p6)
}
  0x26   : > { %s1036_s23 = smov 256   ;;  %s1037_s29 = smov 16  }
  0x27   : > { %817 = dma.hbm_to_vmem [thread:$0]  (!%p1134_p11), %s1332_s1, 4096, %s1127_s11, [#allocation6], %s1036_s23, %s1036_s23, %s1037_s29  }
  0x28   : > { %s904_s17 = scalar_lea.hbm %s1334_s3, 4096 }
  0x29   : > { %p905_p2 = scmp.ne.s32.totalorder %s1334_s3, %s904_s17  ;;  %p911_p10 = scmp.lt.u32.totalorder %s904_s17, %s1334_s3 }
  0x2b   : > { %p907_p1 = pnand %p905_p2, %p878_p13 }
  0x2d   : > { %p908_p6 = pneg %p907_p1 }
  0x2f   : > { %p913_p3 = pnand %p911_p10, %p908_p6 }
  0x31   : > { %916 = shalt.err (!%p913_p3)
}
  0x32   : > { %s917_s11 = scalar_lea.vmem %s1138_s14, 4096  ;;  %p925_p12 = scmp.lt.s32.totalorder %s1138_s14, %s1138_s14 }
  0x33   : > { %p918_p5 = scmp.ne.s32.totalorder %s1138_s14, %s917_s11  ;;  %p926_p0 = scmp.lt.s32.totalorder %s917_s11, %s917_s11 }
  0x35   : > { %p920_p7 = pnand %p918_p5, %p878_p13  ;;  %p927_p2 = por %p926_p0, %p925_p12 }
  0x37   : > { %p921_p9 = pneg %p920_p7 }
  0x39   : > { %p928_p1 = pnand %p927_p2, %p921_p9 }
  0x3b   : > { %931 = shalt.err (!%p928_p1)
}
  0x3c   : > { %s1038_s22 = smov 128   ;;  %s1039_s23 = smov 8  }
  0x3d   : > { %820 = dma.hbm_to_vmem [thread:$0]  (!%p1134_p11), %s1334_s3, 4096, %s1138_s14, [#allocation6], %s1038_s22, %s1038_s22, %s1039_s23  }
  0x3e   : > { %s1193_s13 = sadd.s32 1, %s1032_s27   ;;  %s31_s16 = sadd.s32 1, %s1028_s26 }
  0x3f   : > { %s28_s15 = ssub.s32 %s1032_s27, %s1193_s13  ;;  %p38_p6 = scmp.ne.s32.totalorder %s1028_s26, %s1024_s25 }
  0x40   : > { %p29_p13 = scmp.eq.s32.totalorder %s28_s15, 0  ;;  %p39_p10 = scmp.eq.s32.totalorder %s1032_s27, 0 }
  0x41   : > { %p1346_p5 = scmp.eq.s32.totalorder %s1104_s28, 1  ;;  %p831_p9 = scmp.lt.s32.totalorder %s1032_s27, 2 }
  0x42   : > { %s1202_s17 = scalar_select %p29_p13, %s1028_s26, %s31_s16  }
  0x43   : > { %p40_p3 = por %p39_p10, %p38_p6  ;;  %p1206_p7 = por %p1346_p5, %p38_p6 }
  0x44   : > { %s258_s12 = sand.u32 1, %s1028_s26   ;;  %s690_s14 = sshll.u32 %s1032_s27, 7 }
  0x45   : > { %s1347_s18 = scalar_select %p1206_p7, 1, 0 }
  0x46   : > { %s689_s19 = sshll.u32 %s258_s12, 3  ;;  %s1216_s11 = scalar_lea.hbm %s1331_s0, %s690_s14 }
  0x47   : > { %s262_s22 = scalar_lea.vmem [#allocation2], %s689_s19  ;;  %p1220_p11 = pnand %p831_p9, %p40_p3 }
  0x48   : > { %s269_s23 = sshll.u32 %s262_s22, 4  ;;  %s259_s10 = scalar_lea.sflag [#allocation3], %s258_s12  ;;  %s1218_s23 = int_to_ptr.vmem [resolvable:$true] %s269_s23 }
  0x49   : > { %s932_s15 = scalar_lea.hbm %s1216_s11, 128  ;;  %p934_p0 = pneg %p1220_p11 }
  0x4a   : > { %p933_p12 = scmp.ne.s32.totalorder %s1216_s11, %s932_s15  ;;  %s937_s14 = scalar_lea.hbm %s1331_s0, 256 }
  0x4b   : > { %p938_p13 = scmp.lt.u32.totalorder %s1216_s11, %s1331_s0  ;;  %p939_p6 = scmp.lt.u32.totalorder %s937_s14, %s932_s15 }
  0x4c   : > { %p935_p2 = pnand %p934_p0, %p933_p12  ;;  %p941_p3 = scmp.lt.u32.totalorder %s932_s15, %s1216_s11 }
  0x4d   : > { %p940_p10 = por %p939_p6, %p938_p13 }
  0x4e   : > { %p936_p1 = pneg %p935_p2 }
  0x4f   : > { %p942_p5 = por %p941_p3, %p940_p10 }
  0x51   : > { %p943_p9 = pnand %p942_p5, %p936_p1 }
  0x53   : > { %946 = shalt.err (!%p943_p9)
}
  0x54   : > { %s947_s12 = scalar_lea.vmem %s1218_s23, 128  ;;  %s1040_s22 = smov [#allocation2]  }
  0x55   : > { %p948_p12 = scmp.ne.s32.totalorder %s1218_s23, %s947_s12  ;;  %s952_s16 = sshll.u32 %s1040_s22, 4  ;;  %s953_s16 = int_to_ptr.vmem [resolvable:$false] %s952_s16 }
  0x56   : > { %s954_s19 = scalar_lea.vmem %s953_s16, 256  ;;  %p955_p4 = scmp.lt.s32.totalorder %s1218_s23, %s953_s16 }
  0x57   : > { %p950_p2 = pnand %p948_p12, %p934_p0  ;;  %p956_p13 = scmp.lt.s32.totalorder %s954_s19, %s947_s12 }
  0x59   : > { %p951_p7 = pneg %p950_p2  ;;  %p957_p6 = por %p956_p13, %p955_p4 }
  0x5b   : > { %p958_p10 = pnand %p957_p6, %p951_p7 }
  0x5d   : > { %961 = shalt.err (!%p958_p10)
}
  0x5e   : > { %824 = dma.hbm_to_vmem [thread:$0]  (!%p1220_p11), %s1216_s11, 128, %s1218_s23, %s259_s10  }
  0x5f   : > { %278 = sbr.rel (%p1123_p8) target bundleno = 903 (0x387), region = 48  ;;  %s1252_s15 = sand.u32 (!%p1123_p8), 1, %s1024_s25  }
  0x60   : > { %s692_s14 = sshll.u32 (!%p1123_p8), %s1252_s15, 3  ;;  %s281_s20 = scalar_lea.sflag (!%p1123_p8), [#allocation3], %s1252_s15 }
  0x61   : > { %s1258_s21 = scalar_lea.vmem (!%p1123_p8), [#allocation2], %s692_s14  ;;  %p1349_p4 = scmp.ne.s32.totalorder (!%p1123_p8), %s1342_s30, 0 }
  0x66   : > { %1007 = dma.done.wait (%p1349_p4), %s281_s20, 128  }
  0x67   : > { %1009 = vsyncadd (%p1349_p4), %s281_s20, 4294967168  ;;  %p1350_p7 = scmp.eq.s32.totalorder %s1104_s28, 0 }
  0x69   : > { %1011 = dma.done.wait (%p1350_p7), [#allocation6], 8192   ;;  %p1351_p8 = pmov %p1350_p7 }
  0x6a   : > { %v1041_v0 = vmov 0.0   ;;  %v325_v1 = vld [vmem:[#allocation5 + $0x8] sm:$0xff]  ;;  %v327_v2 = vld [vmem:[#allocation5 + $0x18] sm:$0xff]  ;;  %v324_v3 = vld [vmem:[#allocation5] sm:$0xff]  ;;  %s700_s16 = sshll.u32 %s1104_s28, 7  ;;  %s322_s19 = scalar_lea.vmem [#allocation8], %s692_s14 }
  0x6b   : > { %1013 = vsyncadd (%p1351_p8), [#allocation6], 4294959104  ;;  %432 = vmatprep.mubr.f32.mxu0 %v1041_v0  ;;  %v738_v4 = vpack.c.bf16 %v327_v2, %v325_v1  ;;  %v326_v5 = vld [vmem:[#allocation5 + $0x10] sm:$0xff]  ;;  %v329_v6 = vld [vmem:[#allocation5 + $0x28] sm:$0xff]  ;;  %s595_s20 = sshll.u32 %s322_s19, 4  ;;  %s1287_s9 = scalar_lea.hbm %s1338_s7, %s700_s16  ;;  %s1289_s20 = int_to_ptr.vmem [resolvable:$true] %s595_s20 }
  0x6c   : > { %v331_v7 = vld [vmem:[#allocation5 + $0x38] sm:$0xff]  ;;  %v740_v8 = vpack.c.bf16 %v326_v5, %v324_v3  ;;  %v328_v10 = vld [vmem:[#allocation5 + $0x20] sm:$0xff]  ;;  %v330_v11 = vld [vmem:[#allocation5 + $0x30] sm:$0xff]  ;;  %s582_s11 = scalar_lea.sflag [#allocation4], %s1252_s15  ;;  %s962_s23 = scalar_lea.vmem %s1289_s20, 128 }
  0x6d   : > { %v742_v9 = vpack.c.bf16 %v331_v7, %v329_v6  ;;  %v333_v12 = vld [vmem:[#allocation5 + $0x48] sm:$0xff]  ;;  %739 = vmatprep.subr.bf16.mxu0 %v738_v4  ;;  %v335_v13 = vld [vmem:[#allocation5 + $0x58] sm:$0xff]  ;;  %v744_v14 = vpack.c.bf16 %v330_v11, %v328_v10  ;;  %v332_v16 = vld [vmem:[#allocation5 + $0x40] sm:$0xff]  ;;  %p963_p11 = scmp.ne.s32.totalorder %s1289_s20, %s962_s23  ;;  %p1352_p0 = scmp.ne.s32.totalorder %s1347_s18, 0 }
  0x6e   : > { %741 = vmatpush1.bf16.msra.mxu0 %v740_v8  ;;  %v746_v15 = vpack.c.bf16 %v335_v13, %v333_v12  ;;  %v334_v17 = vld [vmem:[#allocation5 + $0x50] sm:$0xff]  ;;  %v337_v18 = vld [vmem:[#allocation5 + $0x68] sm:$0xff]  ;;  %v339_v19 = vld [vmem:[#allocation5 + $0x78] sm:$0xff]  ;;  %s1042_s28 = smov [#allocation8]  }
  0x6f   : > { %743 = vmatprep.subr.bf16.mxu0 %v742_v9  ;;  %v748_v20 = vpack.c.bf16 %v334_v17, %v332_v16  ;;  %v750_v21 = vpack.c.bf16 %v339_v19, %v337_v18  ;;  %v336_v22 = vld [vmem:[#allocation5 + $0x60] sm:$0xff]  ;;  %v338_v23 = vld [vmem:[#allocation5 + $0x70] sm:$0xff]  ;;  %v341_v24 = vld [vmem:[#allocation5 + $0x88] sm:$0xff]  ;;  %p964_p1 = pnand %p963_p11, %p1352_p0  ;;  %s966_s14 = sshll.u32 %s1042_s28, 4  ;;  %s967_s14 = int_to_ptr.vmem [resolvable:$false] %s966_s14 }
  0x70   : > { %v343_v25 = vld [vmem:[#allocation5 + $0x98] sm:$0xff]  ;;  %v340_v26 = vld [vmem:[#allocation5 + $0x80] sm:$0xff]  ;;  %v342_v27 = vld [vmem:[#allocation5 + $0x90] sm:$0xff]  ;;  %v752_v31 = vpack.c.bf16 %v338_v23, %v336_v22  ;;  %s968_s29 = scalar_lea.vmem %s967_s14, 256  ;;  %p969_p5 = scmp.lt.s32.totalorder %s1289_s20, %s967_s14 }
  0x71   : > { %v457_v28 = vld [vmem:[#allocation7 + $0x80] sm:$0xff]  ;;  %v458_v29 = vld [vmem:[#allocation7 + $0x88] sm:$0xff]  ;;  %v459_v34 = vld [vmem:[#allocation7 + $0x90] sm:$0xff]  ;;  %v754_v36 = vpack.c.bf16 %v343_v25, %v341_v24  ;;  %v756_v46 = vpack.c.bf16 %v342_v27, %v340_v26  ;;  %p965_p3 = pneg %p964_p1  ;;  %p970_p9 = scmp.lt.s32.totalorder %s968_s29, %s962_s23 }
  0x72   : > { %745 = vmatpush1.bf16.msra.mxu0 %v744_v14  ;;  %v441_v30 = vld [vmem:[#allocation7] sm:$0xff]  ;;  %v770_v32 = vpack.c.bf16 %v458_v29, %v457_v28  ;;  %v442_v33 = vld [vmem:[#allocation7 + $0x8] sm:$0xff]  ;;  %v460_v35 = vld [vmem:[#allocation7 + $0x98] sm:$0xff] }
  0x73   : > { %747 = vmatprep.subr.bf16.mxu0 %v746_v15  ;;  %v772_v37 = vpack.c.bf16 %v442_v33, %v441_v30  ;;  %v774_v38 = vpack.c.bf16 %v460_v35, %v459_v34  ;;  %v443_v39 = vld [vmem:[#allocation7 + $0x10] sm:$0xff]  ;;  %v444_v40 = vld [vmem:[#allocation7 + $0x18] sm:$0xff]  ;;  %v461_v41 = vld [vmem:[#allocation7 + $0xa0] sm:$0xff]  ;;  %v358_v34 = vlaneseq  ;;  %p971_p12 = por %p970_p9, %p969_p5 }
  0x74   : > { %v345_v42 = vld [vmem:[#allocation5 + $0xa8] sm:$0xff]  ;;  %v347_v43 = vld [vmem:[#allocation5 + $0xb8] sm:$0xff]  ;;  %771 = vmatprep.subr.bf16.mxu1 %v770_v32  ;;  %v776_v45 = vpack.c.bf16 %v444_v40, %v443_v39  ;;  %v344_v47 = vld [vmem:[#allocation5 + $0xa0] sm:$0xff] }
  0x75   : > { %v462_v44 = vld [vmem:[#allocation7 + $0xa8] sm:$0xff]  ;;  %773 = vmatpush3.bf16.msra.mxu1 %v772_v37  ;;  %v445_v49 = vld [vmem:[#allocation7 + $0x20] sm:$0xff]  ;;  %v758_v51 = vpack.c.bf16 %v347_v43, %v345_v42  ;;  %v346_v52 = vld [vmem:[#allocation5 + $0xb0] sm:$0xff]  ;;  %v359_v35 = vshrl.u32 %v358_v34, 7  ;;  %p972_p2 = pnand %p971_p12, %p965_p3 }
  0x76   : > { %749 = vmatpush1.bf16.msra.mxu0 %v748_v20  ;;  %775 = vmatprep.subr.bf16.mxu1 %v774_v38  ;;  %v778_v48 = vpack.c.bf16 %v462_v44, %v461_v41  ;;  %v446_v50 = vld [vmem:[#allocation7 + $0x28] sm:$0xff]  ;;  %v463_v53 = vld [vmem:[#allocation7 + $0xb0] sm:$0xff]  ;;  %v464_v54 = vld [vmem:[#allocation7 + $0xb8] sm:$0xff]  ;;  %v760_v58 = vpack.c.bf16 %v346_v52, %v344_v47 }
  0x77   : > { %751 = vmatprep.subr.bf16.mxu0 %v750_v21  ;;  %v349_v55 = vld [vmem:[#allocation5 + $0xc8] sm:$0xff]  ;;  %v351_v56 = vld [vmem:[#allocation5 + $0xd8] sm:$0xff]  ;;  %v780_v57 = vpack.c.bf16 %v446_v50, %v445_v49  ;;  %v348_v59 = vld [vmem:[#allocation5 + $0xc0] sm:$0xff]  ;;  %v782_v60 = vpack.c.bf16 %v464_v54, %v463_v53  ;;  %v364_v38 = vsub.s32 1, %v359_v35 }
  0x78   : > { %v447_v61 = vld [vmem:[#allocation7 + $0x30] sm:$0xff]  ;;  %v448_v62 = vld [vmem:[#allocation7 + $0x38] sm:$0xff]  ;;  %v762_v63 = vpack.c.bf16 %v351_v56, %v349_v55  ;;  %v465_v1 = vld [vmem:[#allocation7 + $0xc0] sm:$0xff] }
  0x79   : > { %777 = vmatpush3.bf16.msra.mxu1 %v776_v45  ;;  %v350_v0 = vld [vmem:[#allocation5 + $0xd0] sm:$0xff]  ;;  %v466_v2 = vld [vmem:[#allocation7 + $0xc8] sm:$0xff]  ;;  %v355_v4 = vld [vmem:[#allocation5 + $0xf8] sm:$0xff]  ;;  %v784_v5 = vpack.c.bf16 %v448_v62, %v447_v61 }
  0x7a   : > { %753 = vmatpush1.bf16.msra.mxu0 %v752_v31  ;;  %779 = vmatprep.subr.bf16.mxu1 %v778_v48  ;;  %v353_v3 = vld [vmem:[#allocation5 + $0xe8] sm:$0xff]  ;;  %v764_v6 = vpack.c.bf16 %v350_v0, %v348_v59  ;;  %v352_v7 = vld [vmem:[#allocation5 + $0xe0] sm:$0xff]  ;;  %v786_v8 = vpack.c.bf16 %v466_v2, %v465_v1  ;;  %v354_v12 = vld [vmem:[#allocation5 + $0xf0] sm:$0xff] }
  0x7b   : > { %755 = vmatprep.subr.bf16.mxu0 %v754_v36  ;;  %v449_v9 = vld [vmem:[#allocation7 + $0x40] sm:$0xff]  ;;  %v450_v10 = vld [vmem:[#allocation7 + $0x48] sm:$0xff]  ;;  %v766_v11 = vpack.c.bf16 %v355_v4, %v353_v3  ;;  %v467_v13 = vld [vmem:[#allocation7 + $0xd0] sm:$0xff]  ;;  %v768_v16 = vpack.c.bf16 %v354_v12, %v352_v7  ;;  %v360_v36 = vsub.s32 0, %v359_v35 }
  0x7c   : > { %v468_v14 = vld [vmem:[#allocation7 + $0xd8] sm:$0xff]  ;;  %v788_v15 = vpack.c.bf16 %v450_v10, %v449_v9  ;;  %v451_v18 = vld [vmem:[#allocation7 + $0x50] sm:$0xff]  ;;  %v469_v20 = vld [vmem:[#allocation7 + $0xe0] sm:$0xff] }
  0x7d   : > { %781 = vmatpush3.bf16.msra.mxu1 %v780_v57  ;;  %v790_v17 = vpack.c.bf16 %v468_v14, %v467_v13  ;;  %v452_v19 = vld [vmem:[#allocation7 + $0x58] sm:$0xff]  ;;  %v470_v21 = vld [vmem:[#allocation7 + $0xe8] sm:$0xff]  ;;  %v453_v25 = vld [vmem:[#allocation7 + $0x60] sm:$0xff] }
  0x7e   : > { %757 = vmatpush1.bf16.msra.mxu0 %v756_v46  ;;  %783 = vmatprep.subr.bf16.mxu1 %v782_v60  ;;  %v792_v22 = vpack.c.bf16 %v452_v19, %v451_v18  ;;  %v323_v23 = vld [vmem:[%s1258_s21] sm:$0xff]  ;;  %v794_v24 = vpack.c.bf16 %v470_v21, %v469_v20  ;;  %v454_v26 = vld [vmem:[#allocation7 + $0x68] sm:$0xff] }
  0x7f   : > { %759 = vmatprep.subr.bf16.mxu0 %v758_v51  ;;  %v796_v27 = vpack.c.bf16 %v454_v26, %v453_v25  ;;  %v471_v28 = vld [vmem:[#allocation7 + $0xf0] sm:$0xff]  ;;  %v472_v29 = vld [vmem:[#allocation7 + $0xf8] sm:$0xff] }
  0x80   : > { %v798_v30 = vpack.c.bf16 %v472_v29, %v471_v28  ;;  %v455_v31 = vld [vmem:[#allocation7 + $0x70] sm:$0xff]  ;;  %v456_v32 = vld [vmem:[#allocation7 + $0x78] sm:$0xff] }
  0x81   : > { %785 = vmatpush3.bf16.msra.mxu1 %v784_v5  ;;  %v800_v33 = vpack.c.bf16 %v456_v32, %v455_v31  ;;  %v356_v37 = vld [vmem:[%s1333_s2] sm:$0x3] }
  0x82   : > { %761 = vmatpush1.bf16.msra.mxu0 %v760_v58  ;;  %787 = vmatprep.subr.bf16.mxu1 %v786_v8  ;;  %v361_v39 = vrot.slane %v356_v37, %v360_v36  ;;  %v365_v40 = vrot.slane %v356_v37, %v364_v38  ;;  %v696_v50 = vld [vmem:[%s1335_s4] ss:$0 sm:$0xff] }
  0x83   : > { %763 = vmatprep.subr.bf16.mxu0 %v762_v63  ;;  %v697_v61 = vld [vmem:[%s1336_s5] ss:$0 sm:$0xff] }
  0x84   : > { %v698_v63 = vld [vmem:[%s1337_s6] ss:$0 sm:$0xff] }
  0x85   : > { %789 = vmatpush3.bf16.msra.mxu1 %v788_v15 }
  0x86   : > { %765 = vmatpush1.bf16.msra.mxu0 %v764_v6  ;;  %791 = vmatprep.subr.bf16.mxu1 %v790_v17 }
  0x87   : > { %767 = vmatprep.subr.bf16.mxu0 %v766_v11 }
  0x89   : > { %793 = vmatpush3.bf16.msra.mxu1 %v792_v22 }
  0x8a   : > { %769 = vmatpush1.bf16.msra.mxu0 %v768_v16  ;;  %795 = vmatprep.subr.bf16.mxu1 %v794_v24 }
  0x8d   : > { %433 = vmatmul.mubr.f32.vlgmr.msra.gmra.mrb[0].mxu0 %v323_v23  ;;  %797 = vmatpush3.bf16.msra.mxu1 %v796_v27 }
  0x8e   : > { %799 = vmatprep.subr.bf16.mxu1 %v798_v30 }
  0x91   : > { %801 = vmatpush3.bf16.msra.mxu1 %v800_v33 }
 0x160   : > { %v434_v41 = vpop.f32.mrb[0].mxu0 }
 0x161   : > { %v435_v42 = vadd.f32 %v434_v41, %v361_v39  ;;  %v436_v43 = vpop.f32.mrb[1].mxu0 }
 0x162   : > { %v437_v44 = vadd.f32 %v436_v43, %v365_v40 }
 0x163   : > { %v439_v46 = vmax.f32 %v435_v42, 0.0 }
 0x164   : > { %v440_v45 = vmax.f32 %v437_v44, 0.0 }
 0x166   : > { %537 = vmatprep.mubr.f32.mxu1 %v440_v45 }
 0x167   : > { %538 = vmatmul.mubr.f32.vlgmr.msra.gmra.mrb[0].mxu1 %v439_v46 }
 0x23a   : > { %v735_v47 = vpop.f32.mrb[0].mxu1 }
 0x23b   : > { %v736_v48 = vpop.f32.mrb[1].mxu1 }
 0x23c   : > { %v737_v49 = vadd.f32 %v736_v48, %v735_v47 }
 0x23e   : > { %v546_v51 = vadd.f32 %v737_v49, %v323_v23 }
 0x240   : > { %v553_v52 = vadd.f32 %v696_v50, %v546_v51 }
 0x242   : > { %554 = vadd.xlane.f32.xlu0 %v553_v52 }
 0x2cf   : > { %v555_v53 = vpop.xlane.xlu0 %554 }
 0x2d0   : > { %v557_v54 = vmul.f32 0.0078125, %v555_v53 }
 0x2d2   : > { %v558_v55 = vsub.f32 %v553_v52, %v557_v54 }
 0x2d4   : > { %v559_v56 = vmul.f32 %v558_v55, %v558_v55 }
 0x2d6   : > { %560 = vadd.xlane.f32.xlu0 %v559_v56 }
 0x363   : > { %v561_v57 = vpop.xlane.xlu0 %560 }
 0x364   : > { %v562_v58 = vmul.f32 0.0078125, %v561_v57 }
 0x366   : > { %v563_v59 = vadd.f32 1e-05, %v562_v58 }
 0x368   : > { %874 = vrsqrt.f32 %v563_v59 }
 0x372   : > { %v875_v60 = vpop.eup %874 }
 0x373   : > { %v565_v62 = vmul.f32 %v875_v60, %v558_v55 }
 0x375   : > { %v572_v0 = vmul.f32 %v697_v61, %v565_v62 }
 0x377   : > { %v579_v1 = vadd.f32 %v698_v63, %v572_v0 }
 0x379   : > { %580 = vst [vmem:[%s322_s19] sm:$0xff] %v579_v1 }
 0x37a   : > { %975 = shalt.err (!%p972_p2)
}
 0x37b   : > { %s976_s15 = scalar_lea.hbm %s1287_s9, 128  ;;  %s980_s22 = scalar_lea.hbm %s1338_s7, 256 }
 0x37c   : > { %p977_p13 = scmp.ne.s32.totalorder %s1287_s9, %s976_s15  ;;  %p981_p4 = scmp.lt.u32.totalorder %s1287_s9, %s1338_s7 }
 0x37d   : > { %p982_p7 = scmp.lt.u32.totalorder %s980_s22, %s976_s15  ;;  %p984_p11 = scmp.lt.u32.totalorder %s976_s15, %s1287_s9 }
 0x37e   : > { %p978_p6 = pnand %p977_p13, %p1352_p0 }
 0x37f   : > { %p983_p8 = por %p982_p7, %p981_p4 }
 0x380   : > { %p979_p10 = pneg %p978_p6 }
 0x381   : > { %p985_p1 = por %p984_p11, %p983_p8 }
 0x383   : > { %p986_p3 = pnand %p985_p1, %p979_p10 }
 0x385   : > { %989 = shalt.err (!%p986_p3)
}
 0x386   : > { %812 = dma.vmem_to_hbm [thread:$0]  (%p1352_p0), %s1289_s20, 128, %s1287_s9, %s582_s11  }
 0x387 PF: > { %s607_s21 = sand.u32 1, %s1020_s24   ;;  %p1353_p5 = scmp.ne.s32.totalorder %s1343_s8, 0 }
 0x388   : > { %p1354_p9 = scmp.ge.s32.totalorder %s1032_s27, 2  ;;  %s608_s30 = scalar_lea.sflag [#allocation4], %s607_s21 }
 0x38a   : > { %p826_p12 = pnand %p1354_p9, %p1353_p5 }
 0x38c   : > { %1015 = dma.done.wait (!%p826_p12), %s608_s30, 128  }
 0x38d   : > { %1017 = vsyncadd (!%p826_p12), %s608_s30, 4294967168  ;;  %p21_p2 = scmp.ge.s32.totalorder %s1193_s13, 4   ;;  %s1355_s24 = smov %s1024_s25 }
 0x38e   : > { %s1356_s25 = smov %s1028_s26  ;;  %s1357_s26 = smov %s1202_s17 }
 0x38f   : > { %s1358_s27 = smov %s1193_s13  ;;  %23 = sbr.rel (!%p21_p2) target bundleno = 6 (0x6), region = 101 }
 0x396   :  { %613 = vsyncpa [#allocation3], 1 }
 0x397   :  { %615 = vsyncpa [#allocation3 + $0x1], 1 }
 0x398   :  { %616 = vsyncpa [#allocation6], 1 }
 0x399   :  { %617 = vsyncpa [#allocation4], 1 }
 0x39a   :  { %619 = vsyncpa [#allocation4 + $0x1], 1 }

</bundles_post_ra>
